<compile_context>
chip_gen: v7x
topology: tpu7x:2x2x1
jax: 0.10.0
libtpu: 0.0.40
codegen_flags: <defaults>
</compile_context>

<pallas_src>
import math
from functools import partial

import jax
import jax.numpy as jnp
from jax.experimental import pallas as pl
from jax.experimental.pallas import tpu as pltpu


def _sinusoidal_kernel(time_ref, w_ref, mask_ref, out_ref):
    # time_ref: (TB, G)    f32  - G consecutive timesteps per grouped row
    # w_ref   : (G, G*dim) f32  - W[g, g*dim + d] = freq[d % half], else 0
    # mask_ref: (1, G*dim) f32  - 1.0 on sin lanes, 0.0 on cos lanes
    # out_ref : (TB, G*dim) out dtype (lane-dense: G*dim >= 128 when dim < 128)
    t = time_ref[...]
    w = w_ref[...]
    g_count = w.shape[0]

    # args[r, j] = t[r, j // dim] * freq[(j % dim) % half]
    # Built as an unrolled chain of (TB,1)x(1,GD) broadcast FMAs; each output
    # lane receives exactly one nonzero contribution, so this is exact.
    args = t[:, 0:1] * w[0:1, :]
    for g in range(1, g_count):
        args = args + t[:, g:g + 1] * w[g:g + 1, :]

    m = mask_ref[...]
    out = m * jnp.sin(args) + (1.0 - m) * jnp.cos(args)   # exact select, m in {0,1}
    out_ref[...] = out.astype(out_ref.dtype)


def _round_up(x: int, m: int) -> int:
    return ((x + m - 1) // m) * m


def _choose_group(dim: int) -> int:
    """Timesteps per grouped row so the output lane width G*dim reaches 128."""
    if dim >= 128:
        return 1
    return -(-128 // dim)  # ceil


def _choose_rows(r_total: int, gd: int, max_tile_bytes: int = 2 << 20) -> int:
    """Grouped rows per tile: multiple of 8, output tile <= ~2 MiB, <= 4096."""
    rows = max(8, min(4096, max_tile_bytes // (gd * 4)))
    rows = max(8, (rows // 8) * 8)
    rows = min(rows, _round_up(r_total, 8))
    return rows


@partial(jax.jit, static_argnames=("dim", "out_dtype", "block_rows"))
def sinusoidal_position_embeddings(time: jax.Array, dim: int,
                                   out_dtype=jnp.float32,
                                   block_rows: int | None = None) -> jax.Array:
    """JAX/Pallas equivalent of SinusoidalPositionEmbeddings(dim)(time).

    time: (B,) float array of timesteps.
    returns: (B, dim) = [sin(t*f_0..f_{h-1}), cos(t*f_0..f_{h-1})] per row.
    """
    assert dim % 2 == 0, "dim must be even"
    assert dim >= 4, "dim must be >= 4 (half_dim - 1 must be nonzero)"
    half = dim // 2
    b = time.shape[0]

    # Static tables (constant-folded by XLA: depend only on `dim`).
    scale = math.log(10000.0) / (half - 1)
    freqs = jnp.exp(jnp.arange(half, dtype=jnp.float32) * (-scale))     # (half,)
    freq_row = jnp.concatenate([freqs, freqs])                          # (dim,)
    sin_row = jnp.concatenate([jnp.ones((half,), jnp.float32),
                               jnp.zeros((half,), jnp.float32)])        # (dim,)

    g = _choose_group(dim)
    gd = g * dim
    # W[k, j] = freq_row[j % dim] if j // dim == k else 0   -> (G, G*dim)
    w = (jnp.eye(g, dtype=jnp.float32)[:, :, None]
         * freq_row[None, None, :]).reshape(g, gd)
    mask = jnp.tile(sin_row, (g,)).reshape(1, gd)                       # (1, G*dim)

    # Group timesteps: row r of the grouped view holds timesteps r*G .. r*G+G-1.
    r_total = -(-b // g)
    tb = _choose_rows(r_total, gd)
    if block_rows is not None:
        tb = min(tb, max(8, (block_rows // 8) * 8))
    r_pad = _round_up(r_total, tb)
    b_pad = r_pad * g
    time_g = jnp.pad(time.astype(jnp.float32), (0, b_pad - b)).reshape(r_pad, g)

    grid = (r_pad // tb,)
    out_bytes = jnp.dtype(out_dtype).itemsize

    out_g = pl.pallas_call(
        _sinusoidal_kernel,
        out_shape=jax.ShapeDtypeStruct((r_pad, gd), out_dtype),
        grid=grid,
        in_specs=[
            pl.BlockSpec((tb, g), lambda i: (i, 0)),     # grouped timestep rows
            pl.BlockSpec((g, gd), lambda i: (0, 0)),     # shared freq matrix
            pl.BlockSpec((1, gd), lambda i: (0, 0)),     # shared sin/cos mask
        ],
        out_specs=pl.BlockSpec((tb, gd), lambda i: (i, 0)),
        compiler_params=pltpu.CompilerParams(
            dimension_semantics=("parallel",),           # shard row tiles across TCs
        ),
        cost_estimate=pl.CostEstimate(
            flops=(2 * g + 3) * r_pad * gd,
            transcendentals=2 * r_pad * gd,
            bytes_accessed=r_pad * gd * out_bytes + 4 * r_pad * g + 4 * (g + 1) * gd,
        ),
    )(time_g, w, mask)

    # Free row-major reinterpretation back to (B, dim); drop padding rows.
    return out_g.reshape(b_pad, dim)[:b]


def _reference(time: jax.Array, dim: int) -> jax.Array:
    # Pure-JAX reference mirroring the PyTorch forward.
    half = dim // 2
    emb = math.log(10000.0) / (half - 1)
    emb = jnp.exp(jnp.arange(half, dtype=jnp.float32) * -emb)
    emb = time.astype(jnp.float32)[:, None] * emb[None, :]
    return jnp.concatenate([jnp.sin(emb), jnp.cos(emb)], axis=-1)


if __name__ == "__main__":
    key = jax.random.PRNGKey(0)
    B, DIM = 8, 32
    time = jax.random.uniform(key, (B,), dtype=jnp.float32) * 100.0

    out = jax.block_until_ready(sinusoidal_position_embeddings(time, DIM))
    ref = _reference(time, DIM)
    assert out.shape == (B, DIM)
    assert jnp.allclose(out, ref, atol=1e-5, rtol=1e-5), "mismatch vs reference"

    # Larger, non-multiple-of-tile batch with a small forced tile -> grid > 1.
    B2 = 1000
    time2 = jax.random.uniform(jax.random.PRNGKey(1), (B2,), jnp.float32) * 100.0
    out2 = jax.block_until_ready(
        sinusoidal_position_embeddings(time2, DIM, block_rows=64))
    assert out2.shape == (B2, DIM)
    assert jnp.allclose(out2, _reference(time2, DIM), atol=1e-5, rtol=1e-5)

    # dim >= 128 path (no grouping, G = 1).
    B3, DIM3 = 16, 128
    time3 = jax.random.uniform(jax.random.PRNGKey(2), (B3,), jnp.float32) * 100.0
    out3 = jax.block_until_ready(sinusoidal_position_embeddings(time3, DIM3))
    assert out3.shape == (B3, DIM3)
    assert jnp.allclose(out3, _reference(time3, DIM3), atol=1e-5, rtol=1e-5)

    print("KERNEL_OK")
</pallas_src>

<mosaic_0001>
module attributes {stable_mosaic.version = 11 : i64} {
  func.func @_sinusoidal_kernel(%arg0: i32, %arg1: memref<8x4xf32, #tpu.memory_space<vmem>>, %arg2: memref<4x128xf32, #tpu.memory_space<vmem>>, %arg3: memref<1x128xf32, #tpu.memory_space<vmem>>, %arg4: memref<8x128xf32, #tpu.memory_space<vmem>>) attributes {dimension_semantics = [#tpu.dimension_semantics<parallel>], iteration_bounds = array<i64: 1>, scalar_prefetch = 0 : i64, scratch_operands = 0 : i64, tpu.core_type = #tpu.core_type<tc>, window_params = [{transform_indices = @transform_0, window_bounds = array<i64: 8, 4>}, {pipeline_mode = #tpu.pipeline_mode<synchronous>, transform_indices = @transform_1, window_bounds = array<i64: 4, 128>}, {pipeline_mode = #tpu.pipeline_mode<synchronous>, transform_indices = @transform_2, window_bounds = array<i64: 1, 128>}, {transform_indices = @transform_3, window_bounds = array<i64: 8, 128>}]} {
    %c0 = arith.constant 0 : index
    %c0_0 = arith.constant 0 : index
    %0 = vector.load %arg1[%c0, %c0_0] : memref<8x4xf32, #tpu.memory_space<vmem>>, vector<8x4xf32>
    %c0_1 = arith.constant 0 : index
    %c0_2 = arith.constant 0 : index
    %1 = vector.load %arg2[%c0_1, %c0_2] : memref<4x128xf32, #tpu.memory_space<vmem>>, vector<4x128xf32>
    %2 = vector.extract_strided_slice %0 {offsets = [0, 0], sizes = [8, 1], strides = [1, 1]} : vector<8x4xf32> to vector<8x1xf32>
    %3 = vector.extract_strided_slice %1 {offsets = [0, 0], sizes = [1, 128], strides = [1, 1]} : vector<4x128xf32> to vector<1x128xf32>
    %4 = vector.broadcast %2 : vector<8x1xf32> to vector<8x128xf32>
    %5 = vector.broadcast %3 : vector<1x128xf32> to vector<8x128xf32>
    %6 = arith.mulf %4, %5 : vector<8x128xf32>
    %7 = vector.extract_strided_slice %0 {offsets = [0, 1], sizes = [8, 1], strides = [1, 1]} : vector<8x4xf32> to vector<8x1xf32>
    %8 = vector.extract_strided_slice %1 {offsets = [1, 0], sizes = [1, 128], strides = [1, 1]} : vector<4x128xf32> to vector<1x128xf32>
    %9 = vector.broadcast %7 : vector<8x1xf32> to vector<8x128xf32>
    %10 = vector.broadcast %8 : vector<1x128xf32> to vector<8x128xf32>
    %11 = arith.mulf %9, %10 : vector<8x128xf32>
    %12 = arith.addf %6, %11 : vector<8x128xf32>
    %13 = vector.extract_strided_slice %0 {offsets = [0, 2], sizes = [8, 1], strides = [1, 1]} : vector<8x4xf32> to vector<8x1xf32>
    %14 = vector.extract_strided_slice %1 {offsets = [2, 0], sizes = [1, 128], strides = [1, 1]} : vector<4x128xf32> to vector<1x128xf32>
    %15 = vector.broadcast %13 : vector<8x1xf32> to vector<8x128xf32>
    %16 = vector.broadcast %14 : vector<1x128xf32> to vector<8x128xf32>
    %17 = arith.mulf %15, %16 : vector<8x128xf32>
    %18 = arith.addf %12, %17 : vector<8x128xf32>
    %19 = vector.extract_strided_slice %0 {offsets = [0, 3], sizes = [8, 1], strides = [1, 1]} : vector<8x4xf32> to vector<8x1xf32>
    %20 = vector.extract_strided_slice %1 {offsets = [3, 0], sizes = [1, 128], strides = [1, 1]} : vector<4x128xf32> to vector<1x128xf32>
    %21 = vector.broadcast %19 : vector<8x1xf32> to vector<8x128xf32>
    %22 = vector.broadcast %20 : vector<1x128xf32> to vector<8x128xf32>
    %23 = arith.mulf %21, %22 : vector<8x128xf32>
    %24 = arith.addf %18, %23 : vector<8x128xf32>
    %c0_3 = arith.constant 0 : index
    %c0_4 = arith.constant 0 : index
    %25 = vector.load %arg3[%c0_3, %c0_4] : memref<1x128xf32, #tpu.memory_space<vmem>>, vector<1x128xf32>
    %26 = math.sin %24 : vector<8x128xf32>
    %27 = vector.broadcast %25 : vector<1x128xf32> to vector<8x128xf32>
    %28 = arith.mulf %27, %26 : vector<8x128xf32>
    %cst = arith.constant 1.000000e+00 : f32
    %29 = vector.broadcast %cst : f32 to vector<1x128xf32>
    %30 = arith.subf %29, %25 : vector<1x128xf32>
    %31 = math.cos %24 : vector<8x128xf32>
    %32 = vector.broadcast %30 : vector<1x128xf32> to vector<8x128xf32>
    %33 = arith.mulf %32, %31 : vector<8x128xf32>
    %34 = arith.addf %28, %33 : vector<8x128xf32>
    %c0_5 = arith.constant 0 : index
    %c0_6 = arith.constant 0 : index
    %35 = vector.load %arg4[%c0_5, %c0_6] : memref<8x128xf32, #tpu.memory_space<vmem>>, vector<8x128xf32>
    tpu.vector_store %arg4[%c0_5, %c0_6], %34 {strides = array<i32>} : memref<8x128xf32, #tpu.memory_space<vmem>>, vector<8x128xf32>,
    return
  }
  func.func @transform_0(%arg0: i32) -> (i32, i32) {
    %c0_i32 = arith.constant 0 : i32
    %c0_i32_0 = arith.constant 0 : i32
    return %arg0, %c0_i32 : i32, i32
  }
  func.func @transform_1(%arg0: i32) -> (i32, i32) {
    %c0_i32 = arith.constant 0 : i32
    %c0_i32_0 = arith.constant 0 : i32
    %c0_i32_1 = arith.constant 0 : i32
    return %c0_i32, %c0_i32_0 : i32, i32
  }
  func.func @transform_2(%arg0: i32) -> (i32, i32) {
    %c0_i32 = arith.constant 0 : i32
    %c0_i32_0 = arith.constant 0 : i32
    %c0_i32_1 = arith.constant 0 : i32
    return %c0_i32, %c0_i32_0 : i32, i32
  }
  func.func @transform_3(%arg0: i32) -> (i32, i32) {
    %c0_i32 = arith.constant 0 : i32
    %c0_i32_0 = arith.constant 0 : i32
    return %arg0, %c0_i32 : i32, i32
  }
}

</mosaic_0001>

<bundles_post_ra>
// kernel: tile.7
= control target key start
LH: loop header
LB: loop body
LE: loop exit
PB: predicated region body
PF: predicated region fallthrough
CT: control target
= control target key end

     0   :  { %vm7_vm0 = vcmask 261120   ;;  %s37_s8 = smov 32   ;;  %s38_s9 = smov 64   ;;  %vm13_vm1 = vcmask 1048320   ;;  %vm19_vm2 = vcmask 785920   ;;  %vm25_vm3 = vcmask 523520   ;;  %s55_s0 = inlined_call_operand.vmem [shape: f32[4,32], index: 0, kind: input, shape index: {}]   ;;  %s56_s1 = inlined_call_operand.vmem [shape: f32[1,128], index: 1, kind: output, shape index: {}]  }
   0x1   :  { %v4_v0 = vld [vmem:[%s55_s0] sm:$0xf]  ;;  %s36_s0 = smov 96  }
   0x2   :  { %5 = vst [vmem:[#allocation1] sm:$0xf] %v4_v0 }
   0x9   :  { %v10_v1 = vld [vmem:[#allocation1 + $0x3] sm:$0x1]   ;;  %v22_v2 = vld [vmem:[#allocation1 + $0x1] sm:$0x1]   ;;  %v6_v3 = vld [vmem:[#allocation1] sm:$0x1]  }
   0xa   :  { %11 = vrot.lane.b32.xlu0 %v10_v1, %s36_s0  ;;  %23 = vrot.lane.b32.xlu1 %v22_v2, %s37_s8  ;;  %v16_v4 = vld [vmem:[#allocation1 + $0x2] sm:$0x1]   ;;  %8 = vst.msk [vmem:[#allocation0] sm:$0x1] %vm7_vm0, %v6_v3  }
   0xe   :  { %17 = vrot.lane.b32.xlu0 %v16_v4, %s38_s9 }
  0x7c   :  { %v12_v5 = vpop.permute.xlu0 %11   ;;  %v24_v6 = vpop.permute.xlu1 %23  }
  0x7d   :  { %14 = vst.msk [vmem:[#allocation0] sm:$0x1] %vm13_vm1, %v12_v5  }
  0x80   :  { %v18_v7 = vpop.permute.xlu0 %17  }
  0x81   :  { %20 = vst.msk [vmem:[#allocation0] sm:$0x1] %vm19_vm2, %v18_v7  }
  0x82   :  { %26 = vst.msk [vmem:[#allocation0] sm:$0x1] %vm25_vm3, %v24_v6  }
  0x89   :  { %v30_v8 = vld [vmem:[#allocation0] sm:$0x1] }
  0x8a   :  { %32 = vst [vmem:[%s56_s1] sm:$0x1] %v30_v8 }

// kernel: sinusoidal_position_embeddings.1
= control target key start
LH: loop header
LB: loop body
LE: loop exit
PB: predicated region body
PF: predicated region fallthrough
CT: control target
= control target key end

     0   :  { %v316_v0 = vmov 0   ;;  %v317_v2 = vmov 2   ;;  %v318_v3 = vmov 1   ;;  %v319_v4 = vmov 3   ;;  %s384_s0 = inlined_call_operand.vmem [shape: f32[8,4], index: 0, kind: input, shape index: {}]   ;;  %s385_s1 = inlined_call_operand.vmem [shape: f32[4,128], index: 1, kind: input, shape index: {}]   ;;  %s386_s2 = inlined_call_operand.vmem [shape: f32[1,128], index: 2, kind: input, shape index: {}]   ;;  %s387_s3 = inlined_call_operand.vmem [shape: f32[8,128], index: 3, kind: output, shape index: {}]  }
   0x1   :  { %307 = vset.pattern.permute.xlu0 %v316_v0  ;;  %v14_v1 = vld [vmem:[%s384_s0] sm:$0xff]  ;;  %309 = vset.pattern.permute.xlu1 %v317_v2  ;;  %v21_v5 = vlaneseq  ;;  %v320_v37 = vmov 683565275   ;;  %v321_v39 = vmov 2475754826  }
   0x2   :  { %18 = vperm.xlu0 %307, %v14_v1   ;;  %37 = vperm.xlu1 %309, %v14_v1   ;;  %v15_v9 = vld [vmem:[%s385_s1] sm:$0xf]  ;;  %v322_v42 = vmov 2131351028   ;;  %v323_v45 = vmov 2102212464  }
   0x3   :  { %v22_v6 = vshrl.u32 %v21_v5, 7  ;;  %v324_v48 = vmov 920167782   ;;  %v325_v51 = vmov 1326507024  }
   0x5   :  { %v349_v7 = vsub.s32 0, %v22_v6  ;;  %v32_v8 = vsub.s32 1, %v22_v6  ;;  %v42_v11 = vsub.s32 2, %v22_v6  ;;  %v52_v13 = vsub.s32 3, %v22_v6 }
   0x6   :  { %308 = vset.pattern.permute.xlu0 %v318_v3  ;;  %310 = vset.pattern.permute.xlu1 %v319_v4 }
   0x7   :  { %27 = vperm.xlu0 %308, %v14_v1   ;;  %47 = vperm.xlu1 %310, %v14_v1   ;;  %v24_v14 = vrot.slane %v15_v9, %v349_v7  ;;  %v33_v15 = vrot.slane %v15_v9, %v32_v8  ;;  %v43_v16 = vrot.slane %v15_v9, %v42_v11 }
   0x8   :  { %v53_v17 = vrot.slane %v15_v9, %v52_v13 }
   0xb   :  { %311 = vset.pattern.permute.xlu0 %v319_v4 }
  0x81   :  { %v19_v10 = vpop.permute.xlu0 %18  ;;  %v38_v12 = vpop.permute.xlu1 %37 }
  0x82   :  { %v25_v20 = vmul.f32 %v24_v14, %v19_v10  ;;  %v44_v22 = vmul.f32 %v43_v16, %v38_v12 }
  0x86   :  { %v28_v18 = vpop.permute.xlu0 %27  ;;  %v48_v19 = vpop.permute.xlu1 %47 }
  0x87   :  { %v34_v21 = vmul.f32 %v33_v15, %v28_v18  ;;  %v54_v24 = vmul.f32 %v53_v17, %v48_v19 }
  0x89   :  { %v35_v23 = vadd.f32 %v34_v21, %v25_v20 }
  0x8b   :  { %v45_v25 = vadd.f32 %v44_v22, %v35_v23 }
  0x8d   :  { %v355_v26 = vadd.f32 %v54_v24, %v45_v25 }
  0x8f   :  { %v60_v27 = vand.u32 2139095040, %v355_v26  ;;  %v57_v31 = vand.u32 2147483647, %v355_v26  ;;  %vm59_vm7 = vcmp.lt.s32.totalorder %v355_v26, 0  ;;  %vm149_vm15 = vweird.f32 %v355_v26 }
  0x91   :  { %v61_v28 = vshrl.u32 %v60_v27, 23  ;;  %v64_v34 = vand.u32 8388607, %v57_v31  ;;  %vm58_vm8 = vcmp.le.f32.partialorder %v57_v31, 0.7853982 }
  0x93   :  { %v285_v29 = vadd.s32 4294967169, %v61_v28  ;;  %v65_v53 = vor.u32 8388608, %v64_v34 }
  0x95   :  { %v67_v30 = vadd.s32 1, %v285_v29  ;;  %v105_v3 = vshll.u32 %v65_v53, 8 }
  0x97   :  { %vm68_vm0 = vcmp.gt.s32.totalorder %v67_v30, 0 }
  0x98   :  { %v69_v32 = vsel %vm68_vm0, %v67_v30, 0 }
  0x99   :  { %v71_v33 = vand.u32 31, %v69_v32  ;;  %v70_v36 = vshrl.u32 %v69_v32, 5 }
  0x9b   :  { %v72_v35 = vsub.s32 32, %v71_v33  ;;  %v74_v38 = vshll.u32 %v320_v37, %v71_v33  ;;  %v77_v40 = vshll.u32 %v321_v39, %v71_v33  ;;  %v80_v44 = vshll.u32 %v322_v42, %v71_v33 }
  0x9c   :  { %v83_v47 = vshll.u32 %v323_v45, %v71_v33  ;;  %v86_v50 = vshll.u32 %v324_v48, %v71_v33  ;;  %vm89_vm1 = vcmp.lt.s32.totalorder %v70_v36, 1  ;;  %vm92_vm2 = vcmp.lt.s32.totalorder %v70_v36, 4 }
  0x9d   :  { %v75_v41 = vshrl.u32 %v321_v39, %v72_v35  ;;  %v78_v43 = vshrl.u32 %v322_v42, %v72_v35  ;;  %v81_v46 = vshrl.u32 %v323_v45, %v72_v35  ;;  %v84_v49 = vshrl.u32 %v324_v48, %v72_v35  ;;  %v56_v48 = vld [vmem:[%s386_s2] sm:$0x1] }
  0x9e   :  { %v87_v52 = vshrl.u32 %v325_v51, %v72_v35  ;;  %v73_v62 = vshrl.u32 %v320_v37, %v72_v35  ;;  %vm91_vm3 = vcmp.lt.s32.totalorder %v70_v36, 3  ;;  %vm90_vm4 = vcmp.lt.s32.totalorder %v70_v36, 2 }
  0x9f   :  { %v76_v54 = vor.u32 %v75_v41, %v74_v38  ;;  %v79_v55 = vor.u32 %v78_v43, %v77_v40  ;;  %v82_v56 = vor.u32 %v81_v46, %v80_v44  ;;  %v85_v57 = vor.u32 %v84_v49, %v83_v47 }
  0xa0   :  { %v88_v58 = vor.u32 %v87_v52, %v86_v50  ;;  %v168_v49 = vsub.f32 1.0, %v56_v48 }
  0xa1   :  { %v94_v59 = vsel %vm92_vm2, %v82_v56, 2102212464  ;;  %v97_v60 = vsel %vm89_vm1, %v76_v54, %v79_v55  ;;  %v101_v61 = vsel %vm89_vm1, %v79_v55, %v82_v56  ;;  %v98_v63 = vsel %vm92_vm2, %v85_v57, 920167782 }
  0xa2   :  { %v102_v0 = vsel %vm92_vm2, %v88_v58, 1326507024  ;;  %v99_v1 = vsel %vm91_vm3, %v82_v56, %v98_v63  ;;  %v93_v4 = vsel %vm89_vm1, %v73_v62, %v76_v54  ;;  %v95_v5 = vsel %vm91_vm3, %v79_v55, %v94_v59 }
  0xa3   :  { %v103_v2 = vsel %vm91_vm3, %v85_v57, %v102_v0  ;;  %v100_v6 = vsel %vm90_vm4, %v97_v60, %v99_v1  ;;  %v96_v13 = vsel %vm90_vm4, %v93_v4, %v95_v5  ;;  %v165_v54 = vrot.slane %v56_v48, %v349_v7 }
  0xa4   :  { %v104_v8 = vsel %vm90_vm4, %v101_v61, %v103_v2  ;;  %v364_v11 = vmul.u32.u64.low %v105_v3, %v100_v6  ;;  %v365_v12 = vmul.u32.u64.high %v105_v3, %v100_v6, %v364_v11  ;;  %v112_v15 = vmul.u32 %v105_v3, %v96_v13 }
  0xa5   :  { %v361_v9 = vmul.u32.u64.low %v105_v3, %v104_v8  ;;  %v362_v10 = vmul.u32.u64.high %v105_v3, %v104_v8, %v361_v9  ;;  %v276_v55 = vrot.slane %v168_v49, %v349_v7 }
  0xa6   :  { %v115_v14 = vadd.s32 1, %v365_v12 }
  0xa7   :  { %vm114_vm5 = vc.u32 %v362_v10, %v364_v11  ;;  %v113_v28 = vadd.s32 %v364_v11, %v362_v10 }
  0xa8   :  { %v116_v16 = vsel %vm114_vm5, %v115_v14, %v365_v12 }
  0xa9   :  { %v117_v17 = vadd.s32 %v116_v16, %v112_v15 }
  0xab   :  { %v118_v18 = vadd.s32 536870912, %v117_v17 }
  0xad   :  { %v119_v19 = vshrl.u32 %v118_v18, 30 }
  0xaf   :  { %v120_v20 = vshll.u32 %v119_v19, 30  ;;  %v143_v41 = vsub.s32 4, %v119_v19 }
  0xb1   :  { %v121_v21 = vsub.s32 %v117_v17, %v120_v20  ;;  %v144_v44 = vsel %vm59_vm7, %v143_v41, %v119_v19 }
  0xb2   :  { %v146_v46 = vsel %vm58_vm8, 0, %v144_v44 }
  0xb3   :  { %v123_v22 = vsub.s32 0, %v121_v21  ;;  %v150_v47 = vadd.s32 3, %v146_v46  ;;  %v262_v51 = vand.u32 3, %v146_v46 }
  0xb5   :  { %v286_v23 = vmin.u32 %v123_v22, %v121_v21  ;;  %v151_v50 = vand.u32 3, %v150_v47  ;;  %vm267_vm10 = vcmp.eq.s32.totalorder %v262_v51, 2  ;;  %vm264_vm12 = vcmp.eq.s32.totalorder %v262_v51, 0 }
  0xb6   :  { %vm263_vm14 = vcmp.lt.s32.totalorder %v262_v51, 2 }
  0xb7   :  { %v125_v24 = vclz %v286_v23  ;;  %vm156_vm9 = vcmp.eq.s32.totalorder %v151_v50, 2  ;;  %vm153_vm11 = vcmp.eq.s32.totalorder %v151_v50, 0  ;;  %vm152_vm13 = vcmp.lt.s32.totalorder %v151_v50, 2 }
  0xb9   :  { %v287_v25 = vadd.s32 4294967294, %v125_v24 }
  0xbb   :  { %vm288_vm6 = vcmp.lt.s32.totalorder %v287_v25, 0 }
  0xbc   :  { %v128_v27 = vsel %vm288_vm6, 0, %v287_v25 }
  0xbd   :  { %v129_v29 = vsub.s32 32, %v128_v27  ;;  %v133_v30 = vsub.s32 4294967266, %v128_v27  ;;  %v130_v32 = vshll.u32 %v121_v21, %v128_v27 }
  0xbf   :  { %v131_v33 = vshrl.u32 %v113_v28, %v129_v29  ;;  %v134_v34 = vadd.s32 127, %v133_v30 }
  0xc1   :  { %v132_v35 = vor.u32 %v131_v33, %v130_v32  ;;  %v135_v36 = vshll.u32 %v134_v34, 23 }
  0xc3   :  { %v136_v37 = vor.u32 4788187, %v135_v36  ;;  %v139_v39 = vcvt.s32.f32 %v132_v35 }
  0xc5   :  { %v137_v38 = vand.u32 2147483647, %v136_v37 }
  0xc7   :  { %v140_v40 = vmul.f32 %v139_v39, %v137_v38 }
  0xc9   :  { %v141_v42 = vxor.u32 2147483648, %v140_v40 }
  0xcb   :  { %v142_v43 = vsel %vm59_vm7, %v141_v42, %v140_v40 }
  0xcc   :  { %v145_v45 = vsel %vm58_vm8, %v355_v26, %v142_v43 }
  0xcd   :  { %312 = vcosq.f32 %v145_v45 }
  0xce   :  { %314 = vsinq.f32 %v145_v45 }
  0xd7   :  { %v313_v52 = vpop.eup %312 }
  0xd8   :  { %v315_v53 = vpop.eup %314  ;;  %v157_v31 = vxor.u32 2147483648, %v313_v52 }
  0xd9   :  { %v154_v56 = vxor.u32 2147483648, %v315_v53 }
  0xda   :  { %v158_v57 = vsel %vm156_vm9, %v157_v31, %v315_v53  ;;  %v269_v58 = vsel %vm267_vm10, %v157_v31, %v315_v53 }
  0xdb   :  { %v155_v59 = vsel %vm153_vm11, %v313_v52, %v154_v56  ;;  %v266_v60 = vsel %vm264_vm12, %v313_v52, %v154_v56 }
  0xdc   :  { %v159_v61 = vsel %vm152_vm13, %v155_v59, %v158_v57  ;;  %v270_v62 = vsel %vm263_vm14, %v266_v60, %v269_v58 }
  0xdd   :  { %v160_v63 = vsel %vm149_vm15, nan, %v159_v61  ;;  %v271_v0 = vsel %vm149_vm15, nan, %v270_v62 }
  0xde   :  { %v167_v1 = vmul.f32 %v165_v54, %v160_v63  ;;  %v278_v2 = vmul.f32 %v276_v55, %v271_v0 }
  0xe0   :  { %v279_v7 = vadd.f32 %v278_v2, %v167_v1 }
  0xe2   :  { %280 = vst [vmem:[%s387_s3] sm:$0xff] %v279_v7 }

</bundles_post_ra>
